<compile_context>
chip_gen: v7x
topology: tpu7x:2x2x1
jax: 0.10.0
libtpu: 0.0.40
codegen_flags: <defaults>
</compile_context>

<pallas_src>
import math
import functools

import jax
import jax.numpy as jnp
from jax.experimental import pallas as pl
from jax.experimental.pallas import tpu as pltpu


_TILE_S_MAX = 256     # second-minor (sublane) tile cap
_TILE_F_MAX = 1024    # minor (lane) tile cap, multiple of 128


def build_pe_table(d_model: int, max_len: int = 100) -> jnp.ndarray:
    """Sin/cos positional-encoding buffer, shape (max_len, d_model), float32."""
    position = jnp.arange(0, max_len, dtype=jnp.float32)[:, None]           # (L, 1)
    div_term = jnp.exp(jnp.arange(0, d_model, 2, dtype=jnp.float32)
                       * (-math.log(10000.0) / d_model))                    # (D/2,)
    pe = jnp.zeros((max_len, d_model), dtype=jnp.float32)
    pe = pe.at[:, 0::2].set(jnp.sin(position * div_term))
    pe = pe.at[:, 1::2].set(jnp.cos(position * div_term))
    return pe


def _eval_kernel(x_ref, pe_ref, o_ref):
    # Elementwise add in f32 (v5e has no bf16 VALU), cast on store.
    y = x_ref[...].astype(jnp.float32) + pe_ref[...].astype(jnp.float32)
    o_ref[...] = y.astype(o_ref.dtype)


def _make_train_kernel(dropout_p: float):
    keep_prob = 1.0 - dropout_p
    scale = 1.0 / keep_prob
    # P(bits >= threshold) == keep_prob; clamp so p ~= 1.0 cannot wrap to 0.
    threshold = min(int(round(dropout_p * 2.0 ** 32)), 2 ** 32 - 1)

    def kernel(x_ref, pe_ref, bits_ref, o_ref):
        y = x_ref[...].astype(jnp.float32) + pe_ref[...].astype(jnp.float32)
        keep = bits_ref[...] >= jnp.uint32(threshold)
        o_ref[...] = jnp.where(keep, y * scale, 0.0).astype(o_ref.dtype)

    return kernel


@functools.partial(jax.jit, static_argnames=("dropout_p", "training"))
def positional_encoding(x, pe_table, rng_key=None, *, dropout_p: float = 0.1,
                        training: bool = False):
    """Forward of PositionalEncoding.

    x        : (seq_len, batch, d_model)
    pe_table : (max_len, d_model) float32, from build_pe_table()
    rng_key  : jax PRNG key; required only when training and dropout_p > 0
               (vary it per step — a fixed key gives a fixed dropout mask).
    """
    seq_len, batch, d_model = x.shape
    feat = batch * d_model

    # Lane-dense 2-D view: last dim (batch*d_model) maps to the lane axis.
    x2 = x.reshape(seq_len, feat)
    # pe broadcast over batch in the same layout (layout plumbing, not compute).
    pe2 = jnp.tile(pe_table[:seq_len].astype(x.dtype), (1, batch))

    tile_s = min(seq_len, _TILE_S_MAX)
    tile_f = min(feat, _TILE_F_MAX)
    grid = (pl.cdiv(seq_len, tile_s), pl.cdiv(feat, tile_f))
    spec = pl.BlockSpec((tile_s, tile_f), lambda i, j: (i, j))

    use_dropout = training and dropout_p > 0.0
    if use_dropout:
        if rng_key is None:
            raise ValueError("rng_key is required when training with dropout_p > 0")
        bits = jax.random.bits(rng_key, (seq_len, feat), dtype=jnp.uint32)
        kernel = _make_train_kernel(dropout_p)
        in_specs = [spec, spec, spec]
        args = (x2, pe2, bits)
    else:
        kernel = _eval_kernel
        in_specs = [spec, spec]
        args = (x2, pe2)

    out2 = pl.pallas_call(
        kernel,
        out_shape=jax.ShapeDtypeStruct((seq_len, feat), x.dtype),
        grid=grid,
        in_specs=in_specs,
        out_specs=spec,
        input_output_aliases={0: 0},          # pure overwrite of x
        compiler_params=pltpu.CompilerParams(
            dimension_semantics=("parallel", "parallel")),
    )(*args)

    return out2.reshape(seq_len, batch, d_model)


if __name__ == "__main__":
    d_model = 32
    seq_len = 8
    batch = 2
    max_len = 100
    dropout_p = 0.1

    key = jax.random.PRNGKey(0)
    kx, kd = jax.random.split(key)
    x = jax.random.normal(kx, (seq_len, batch, d_model), dtype=jnp.float32)
    pe_table = build_pe_table(d_model, max_len=max_len)

    # Eval mode (dropout is identity), matching module.eval() semantics.
    out = positional_encoding(x, pe_table, dropout_p=dropout_p, training=False)
    out = jax.block_until_ready(out)

    ref = x + pe_table[:seq_len][:, None, :]
    assert out.shape == x.shape
    assert jnp.allclose(out, ref, atol=1e-6), "eval-mode mismatch vs reference"

    # Training mode: inverted dropout applied to (x + pe).
    out_train = positional_encoding(x, pe_table, kd, dropout_p=dropout_p,
                                    training=True)
    out_train = jax.block_until_ready(out_train)
    assert out_train.shape == x.shape
    kept = out_train != 0.0
    scaled = ref / (1.0 - dropout_p)
    assert jnp.allclose(jnp.where(kept, out_train, 0.0),
                        jnp.where(kept, scaled, 0.0),
                        atol=1e-5, rtol=1e-5), "training-mode kept-element mismatch"

    print("KERNEL_OK")
</pallas_src>

<mosaic_0001>
module attributes {stable_mosaic.version = 11 : i64} {
  func.func @_eval_kernel(%arg0: i32, %arg1: i32, %arg2: memref<8x64xf32, #tpu.memory_space<vmem>>, %arg3: memref<8x64xf32, #tpu.memory_space<vmem>>, %arg4: memref<8x64xf32, #tpu.memory_space<vmem>>) attributes {dimension_semantics = [#tpu.dimension_semantics<parallel>, #tpu.dimension_semantics<parallel>], iteration_bounds = array<i64: 1, 1>, scalar_prefetch = 0 : i64, scratch_operands = 0 : i64, tpu.core_type = #tpu.core_type<tc>, window_params = [{transform_indices = @transform_0, window_bounds = array<i64: 8, 64>}, {transform_indices = @transform_1, window_bounds = array<i64: 8, 64>}, {transform_indices = @transform_2, window_bounds = array<i64: 8, 64>}]} {
    %c0 = arith.constant 0 : index
    %c0_0 = arith.constant 0 : index
    %0 = vector.load %arg2[%c0, %c0_0] : memref<8x64xf32, #tpu.memory_space<vmem>>, vector<8x64xf32>
    %c0_1 = arith.constant 0 : index
    %c0_2 = arith.constant 0 : index
    %1 = vector.load %arg3[%c0_1, %c0_2] : memref<8x64xf32, #tpu.memory_space<vmem>>, vector<8x64xf32>
    %2 = arith.addf %0, %1 : vector<8x64xf32>
    %c0_3 = arith.constant 0 : index
    %c0_4 = arith.constant 0 : index
    %3 = vector.load %arg4[%c0_3, %c0_4] : memref<8x64xf32, #tpu.memory_space<vmem>>, vector<8x64xf32>
    tpu.vector_store %arg4[%c0_3, %c0_4], %2 {strides = array<i32>} : memref<8x64xf32, #tpu.memory_space<vmem>>, vector<8x64xf32>,
    return
  }
  func.func @transform_0(%arg0: i32, %arg1: i32) -> (i32, i32) {
    %c0_i32 = arith.constant 0 : i32
    return %arg0, %arg1 : i32, i32
  }
  func.func @transform_1(%arg0: i32, %arg1: i32) -> (i32, i32) {
    %c0_i32 = arith.constant 0 : i32
    return %arg0, %arg1 : i32, i32
  }
  func.func @transform_2(%arg0: i32, %arg1: i32) -> (i32, i32) {
    %c0_i32 = arith.constant 0 : i32
    return %arg0, %arg1 : i32, i32
  }
}

</mosaic_0001>

<bundles_post_ra>
// kernel: tile.9
= control target key start
LH: loop header
LB: loop body
LE: loop exit
PB: predicated region body
PF: predicated region fallthrough
CT: control target
= control target key end

     0   :  { %vm42_vm0 = vcmask 1047556   ;;  %vm44_vm1 = vcmask 261120   ;;  %vm54_vm2 = vcmask 523520   ;;  %s111_s0 = inlined_call_operand.vmem [shape: f32[8,2,32], index: 0, kind: input, shape index: {}]   ;;  %s112_s1 = inlined_call_operand.vmem [shape: f32[8,64], index: 1, kind: output, shape index: {}]  }
   0x1   :  { %v62_v0 = vld [vmem:[%s111_s0 + $0xe] sm:$0x3]  ;;  %v63_v1 = vld [vmem:[%s111_s0 + $0xc] sm:$0x3]  ;;  %v64_v2 = vld [vmem:[%s111_s0 + $0xa] sm:$0x3] }
   0x2   :  { %8 = vst [vmem:[#allocation0 + $0x38] sm:$0x3] %v62_v0  ;;  %13 = vst [vmem:[#allocation0 + $0x30] sm:$0x3] %v63_v1  ;;  %v65_v3 = vld [vmem:[%s111_s0 + $0x8] sm:$0x3] }
   0x3   :  { %18 = vst [vmem:[#allocation0 + $0x28] sm:$0x3] %v64_v2  ;;  %v66_v4 = vld [vmem:[%s111_s0 + $0x6] sm:$0x3]  ;;  %v67_v5 = vld [vmem:[%s111_s0 + $0x4] sm:$0x3] }
   0x4   :  { %23 = vst [vmem:[#allocation0 + $0x20] sm:$0x3] %v65_v3  ;;  %28 = vst [vmem:[#allocation0 + $0x18] sm:$0x3] %v66_v4  ;;  %v68_v6 = vld [vmem:[%s111_s0 + $0x2] sm:$0x3] }
   0x5   :  { %33 = vst [vmem:[#allocation0 + $0x10] sm:$0x3] %v67_v5  ;;  %v38_v7 = vld [vmem:[%s111_s0] sm:$0x3]  ;;  %37 = vst [vmem:[#allocation0 + $0x8] sm:$0x3] %v68_v6 }
   0x6   :  { %39 = vst [vmem:[#allocation0] sm:$0x3] %v38_v7  ;;  %s70_s0 = smov 32  }
   0xb   :  { %v41_v8 = vld [vmem:[#allocation0] ss:$8 sm:$0xf0]   ;;  %v49_v9 = vld [vmem:[#allocation0 + $0x1] ss:$8 sm:$0xf0]  }
   0xd   :  { %v40_v10 = vld [vmem:[#allocation0] ss:$8 sm:$0xf]   ;;  %v47_v11 = vld [vmem:[#allocation0 + $0x1] ss:$8 sm:$0xf]  }
   0xe   :  { %v43_v12 = vsel %vm42_vm0, %v41_v8, %v40_v10  ;;  %v51_v13 = vsel %vm42_vm0, %v49_v9, %v47_v11 }
   0xf   :  { %52 = vrot.lane.b32.xlu0 %v51_v13, %s70_s0  ;;  %45 = vst.msk [vmem:[%s112_s1] sm:$0xff] %vm44_vm1, %v43_v12  }
  0x81   :  { %v53_v14 = vpop.permute.xlu0 %52  }
  0x82   :  { %55 = vst.msk [vmem:[%s112_s1] sm:$0xff] %vm54_vm2, %v53_v14  }

// kernel: positional_encoding.1
= control target key start
LH: loop header
LB: loop body
LE: loop exit
PB: predicated region body
PF: predicated region fallthrough
CT: control target
= control target key end

     0   :  { %vm14_vm0 = vcmask 523264   ;;  %s44_s0 = inlined_call_operand.vmem [shape: f32[8,64], index: 0, kind: input, shape index: {}, may-alias: {0,2}]   ;;  %s45_s1 = inlined_call_operand.vmem [shape: f32[8,64], index: 1, kind: input, shape index: {}]   ;;  %s46_s2 = inlined_call_operand.vmem [shape: f32[8,64], index: 2, kind: output, shape index: {}, may-alias: {0,2}]  }
   0x1   :  { %v11_v0 = vld [vmem:[%s44_s0] sm:$0xff] }
   0x2   :  { %v12_v1 = vld [vmem:[%s45_s1] sm:$0xff] }
   0x3   :  { %v13_v2 = vadd.f32 %v12_v1, %v11_v0 }
   0x5   :  { %15 = vst.msk [vmem:[%s46_s2] sm:$0xff] %vm14_vm0, %v13_v2 }

</bundles_post_ra>
